<compile_context>
chip_gen: v6e
topology: v6e:2x2x1
jax: 0.10.0
libtpu: 0.0.40
codegen_flags: <defaults>
</compile_context>

<pallas_src>
import jax
import jax.numpy as jnp
from jax.experimental import pallas as pl
from jax.experimental.pallas import tpu as pltpu

EPS = 1e-5


def _transition_kernel(x_ref, scale_ref, shift_ref, w_ref, o_ref):
    # x_ref     : (TM, K4)        bf16  window-stacked rows, K ordered (dy, dx, c), c innermost
    # scale_ref : (1, K4)         f32   BN gamma * rsqrt(var+eps), tiled x4 (zero on channel pad)
    # shift_ref : (1, K4)         f32   BN beta - mean*scale,      tiled x4 (zero on channel pad)
    # w_ref     : (K4, COUT_P)    bf16  conv weight tiled x4, * 0.25, zero-padded rows/cols
    # o_ref     : (TM, COUT_P)    bf16
    x = x_ref[...].astype(jnp.float32)                       # f32 VPU affine (v5e: no bf16 VPU)
    y = jnp.maximum(x * scale_ref[...] + shift_ref[...], 0.0)
    z = jnp.dot(y.astype(jnp.bfloat16), w_ref[...],
                preferred_element_type=jnp.float32)          # bf16 MXU operands, f32 accumulate
    o_ref[...] = z.astype(o_ref.dtype)


def _vmem_capacity_bytes():
    """Physical VMEM per TensorCore; conservative fallback if the query is unavailable."""
    try:
        info = pltpu.get_tpu_info()
        for attr in ("vmem_capacity_bytes", "vmem_bytes", "vmem_size_bytes"):
            v = getattr(info, attr, None)
            if v:
                return int(v)
    except Exception:
        pass
    return 64 << 20  # v7x per-TC size; a safe lower bound for v5e/v6e as well


def transition_layer(x_nchw, gamma, beta, running_mean, running_var, conv_w):
    """Pallas TransitionLayer forward (eval-mode BN).
    x_nchw: (N, Cin, H, W) float32.  conv_w: (Cout, Cin, 1, 1).
    Returns (N, Cout, H//2, W//2) float32 (PyTorch eval-mode semantics, bf16-path precision)."""
    n, cin, h, w = x_nchw.shape
    cout = conv_w.shape[0]
    hp, wp = h // 2, w // 2                      # AvgPool2d(2,2) floors odd spatial dims
    m = n * hp * wp

    # Lane-dense K: pad channels so 4*Cin_p is a multiple of 128 (>=128 even for tiny Cin).
    cin_p = ((cin + 31) // 32) * 32
    k4 = 4 * cin_p
    cout_p = pl.cdiv(cout, 128) * 128            # lane-dense output columns (vst, not vst.msk)

    # ---- glue: ONE fused pass  cast(bf16) -> channel-pad -> window-stack transpose ----
    xb = x_nchw.astype(jnp.bfloat16)
    if cin_p != cin:
        xb = jnp.pad(xb, ((0, 0), (0, cin_p - cin), (0, 0), (0, 0)))
    xb = xb[:, :, :2 * hp, :2 * wp].reshape(n, cin_p, hp, 2, wp, 2)
    xp = jnp.transpose(xb, (0, 2, 4, 3, 5, 1)).reshape(m, k4)       # (M, 4*Cin_p)

    # ---- BN folded once to per-channel scale/shift (f32, tiled x4 along K) ----
    inv_std = jax.lax.rsqrt(running_var.astype(jnp.float32) + EPS)
    scale = gamma.astype(jnp.float32) * inv_std
    shift = beta.astype(jnp.float32) - running_mean.astype(jnp.float32) * scale
    scale = jnp.pad(scale, (0, cin_p - cin))
    shift = jnp.pad(shift, (0, cin_p - cin))
    scale4 = jnp.tile(scale, 4).reshape(1, k4)
    shift4 = jnp.tile(shift, 4).reshape(1, k4)

    # ---- conv(1x1) + avgpool fused weight: tiled x4 along K, pre-scaled by 0.25 ----
    wmat = conv_w[:, :, 0, 0].astype(jnp.float32).T * 0.25           # (Cin, Cout)
    wmat = jnp.pad(wmat, ((0, cin_p - cin), (0, cout_p - cout)))
    w4 = jnp.concatenate([wmat] * 4, axis=0).astype(jnp.bfloat16)    # (4*Cin_p, Cout_p)

    # ---- generation-aware VMEM budget and adaptive row tile TM ----
    vmem_cap = _vmem_capacity_bytes()
    vmem_limit = int(min(max(int(vmem_cap * 0.75), 32 << 20), 112 << 20))
    row_bytes = 2 * 2 * (k4 + cout_p)                 # bf16 x + bf16 out, double-buffered
    invariant_bytes = k4 * cout_p * 2 + 2 * k4 * 4    # single copy of weight + scale + shift
    tile_budget = max(int(vmem_limit * 0.6) - invariant_bytes, 2 << 20)
    tm = tile_budget // row_bytes
    if m >= 8:
        tm = max(8, min(tm, 4096, m))
        tm = (tm // 8) * 8
    else:
        tm = m
    n_blocks = pl.cdiv(m, tm)        # partial last block (if any) is masked by Pallas

    cost = pl.CostEstimate(
        flops=2 * m * k4 * cout_p + 3 * m * k4,
        transcendentals=0,
        bytes_accessed=m * k4 * 2 + m * cout_p * 2 + k4 * cout_p * 2 + 2 * k4 * 4,
    )

    def _run(single_buffer_invariants):
        const_kw = {"pipeline_mode": pl.Buffered(1)} if single_buffer_invariants else {}
        return pl.pallas_call(
            _transition_kernel,
            out_shape=jax.ShapeDtypeStruct((m, cout_p), jnp.bfloat16),
            grid_spec=pltpu.PrefetchScalarGridSpec(
                num_scalar_prefetch=0,
                grid=(n_blocks,),
                in_specs=[
                    pl.BlockSpec((tm, k4), lambda i: (i, 0)),
                    pl.BlockSpec((1, k4), lambda i: (0, 0), **const_kw),
                    pl.BlockSpec((1, k4), lambda i: (0, 0), **const_kw),
                    pl.BlockSpec((k4, cout_p), lambda i: (0, 0), **const_kw),
                ],
                out_specs=pl.BlockSpec((tm, cout_p), lambda i: (i, 0)),
            ),
            compiler_params=pltpu.CompilerParams(
                dimension_semantics=("parallel",),
                vmem_limit_bytes=vmem_limit),
            cost_estimate=cost,
        )(xp, scale4, shift4, w4)

    try:
        out = _run(True)      # invariant operands single-buffered (they are DMA'd once)
    except Exception:
        out = _run(False)     # robust fallback: default double-buffering

    # ---- glue: drop channel pad, back to NCHW, restore the module's f32 interface ----
    out = out[:, :cout].reshape(n, hp, wp, cout)
    return jnp.transpose(out, (0, 3, 1, 2)).astype(jnp.float32)


def _reference(x, gamma, beta, mean, var, conv_w):
    """Pure-JAX reference of the PyTorch module (eval-mode BN), NCHW in/out, f32."""
    inv = jax.lax.rsqrt(var + EPS)
    xn = (x - mean[None, :, None, None]) * inv[None, :, None, None]
    xn = xn * gamma[None, :, None, None] + beta[None, :, None, None]
    y = jnp.maximum(xn, 0.0)
    z = jnp.einsum('nchw,oc->nohw', y, conv_w[:, :, 0, 0])
    nb, co, hh, ww = z.shape
    return z.reshape(nb, co, hh // 2, 2, ww // 2, 2).mean(axis=(3, 5))


if __name__ == "__main__":
    N, CIN, COUT, H, W = 2, 4, 2, 16, 16

    key = jax.random.PRNGKey(0)
    kx, kg, kb, km, kv, kw = jax.random.split(key, 6)

    x = jax.random.normal(kx, (N, CIN, H, W), dtype=jnp.float32)
    gamma = jax.random.normal(kg, (CIN,), dtype=jnp.float32) * 0.1 + 1.0
    beta = jax.random.normal(kb, (CIN,), dtype=jnp.float32) * 0.1
    running_mean = jax.random.normal(km, (CIN,), dtype=jnp.float32) * 0.1
    running_var = jax.random.uniform(kv, (CIN,), dtype=jnp.float32,
                                     minval=0.5, maxval=1.5)
    conv_w = jax.random.normal(kw, (COUT, CIN, 1, 1), dtype=jnp.float32) * 0.3

    out = transition_layer(x, gamma, beta, running_mean, running_var, conv_w)
    out = jax.block_until_ready(out)

    ref = _reference(x, gamma, beta, running_mean, running_var, conv_w)
    assert out.shape == (N, COUT, H // 2, W // 2), out.shape
    # bf16 activations + bf16 MXU operands (f32 accumulation) -> ~1e-2 level tolerance.
    assert jnp.allclose(out, ref, atol=4e-2, rtol=4e-2), \
        float(jnp.max(jnp.abs(out - ref)))

    print("KERNEL_OK")
</pallas_src>

<mosaic_0001>
module attributes {stable_mosaic.version = 11 : i64} {
  func.func @_transition_kernel(%arg0: i32, %arg1: memref<128x128xbf16, #tpu.memory_space<vmem>>, %arg2: memref<1x128xf32, #tpu.memory_space<vmem>>, %arg3: memref<1x128xf32, #tpu.memory_space<vmem>>, %arg4: memref<128x128xbf16, #tpu.memory_space<vmem>>, %arg5: memref<128x128xbf16, #tpu.memory_space<vmem>>) attributes {dimension_semantics = [#tpu.dimension_semantics<parallel>], iteration_bounds = array<i64: 1>, scalar_prefetch = 0 : i64, scratch_operands = 0 : i64, tpu.core_type = #tpu.core_type<tc>, window_params = [{transform_indices = @transform_0, window_bounds = array<i64: 128, 128>}, {pipeline_mode = #tpu.pipeline_mode<synchronous>, transform_indices = @transform_1, window_bounds = array<i64: 1, 128>}, {pipeline_mode = #tpu.pipeline_mode<synchronous>, transform_indices = @transform_2, window_bounds = array<i64: 1, 128>}, {pipeline_mode = #tpu.pipeline_mode<synchronous>, transform_indices = @transform_3, window_bounds = array<i64: 128, 128>}, {transform_indices = @transform_4, window_bounds = array<i64: 128, 128>}]} {
    %c0 = arith.constant 0 : index
    %c0_0 = arith.constant 0 : index
    %0 = vector.load %arg1[%c0, %c0_0] : memref<128x128xbf16, #tpu.memory_space<vmem>>, vector<128x128xbf16>
    %1 = arith.extf %0 : vector<128x128xbf16> to vector<128x128xf32>
    %c0_1 = arith.constant 0 : index
    %c0_2 = arith.constant 0 : index
    %2 = vector.load %arg2[%c0_1, %c0_2] : memref<1x128xf32, #tpu.memory_space<vmem>>, vector<1x128xf32>
    %3 = vector.broadcast %2 : vector<1x128xf32> to vector<128x128xf32>
    %4 = arith.mulf %1, %3 : vector<128x128xf32>
    %c0_3 = arith.constant 0 : index
    %c0_4 = arith.constant 0 : index
    %5 = vector.load %arg3[%c0_3, %c0_4] : memref<1x128xf32, #tpu.memory_space<vmem>>, vector<1x128xf32>
    %6 = vector.broadcast %5 : vector<1x128xf32> to vector<128x128xf32>
    %7 = arith.addf %4, %6 : vector<128x128xf32>
    %cst = arith.constant 0.000000e+00 : f32
    %8 = vector.broadcast %cst : f32 to vector<128x128xf32>
    %9 = arith.maximumf %7, %8 : vector<128x128xf32>
    %10 = arith.truncf %9 : vector<128x128xf32> to vector<128x128xbf16>
    %c0_5 = arith.constant 0 : index
    %c0_6 = arith.constant 0 : index
    %11 = vector.load %arg4[%c0_5, %c0_6] : memref<128x128xbf16, #tpu.memory_space<vmem>>, vector<128x128xbf16>
    %cst_7 = arith.constant dense<0.000000e+00> : vector<128x128xf32>
    %12 = tpu.matmul %10, %11, %cst_7 {dimension_numbers = #tpu.dot_dimension_numbers<[1], [0], [0], [1], [0, 0, 1, 1], [], []>} : vector<128x128xbf16>, vector<128x128xbf16>, vector<128x128xf32> -> vector<128x128xf32>
    %13 = arith.truncf %12 : vector<128x128xf32> to vector<128x128xbf16>
    %c0_8 = arith.constant 0 : index
    %c0_9 = arith.constant 0 : index
    %14 = vector.load %arg5[%c0_8, %c0_9] : memref<128x128xbf16, #tpu.memory_space<vmem>>, vector<128x128xbf16>
    tpu.vector_store %arg5[%c0_8, %c0_9], %13 {strides = array<i32>} : memref<128x128xbf16, #tpu.memory_space<vmem>>, vector<128x128xbf16>,
    return
  }
  func.func @transform_0(%arg0: i32) -> (i32, i32) {
    %c0_i32 = arith.constant 0 : i32
    %c0_i32_0 = arith.constant 0 : i32
    return %arg0, %c0_i32 : i32, i32
  }
  func.func @transform_1(%arg0: i32) -> (i32, i32) {
    %c0_i32 = arith.constant 0 : i32
    %c0_i32_0 = arith.constant 0 : i32
    %c0_i32_1 = arith.constant 0 : i32
    return %c0_i32, %c0_i32_0 : i32, i32
  }
  func.func @transform_2(%arg0: i32) -> (i32, i32) {
    %c0_i32 = arith.constant 0 : i32
    %c0_i32_0 = arith.constant 0 : i32
    %c0_i32_1 = arith.constant 0 : i32
    return %c0_i32, %c0_i32_0 : i32, i32
  }
  func.func @transform_3(%arg0: i32) -> (i32, i32) {
    %c0_i32 = arith.constant 0 : i32
    %c0_i32_0 = arith.constant 0 : i32
    %c0_i32_1 = arith.constant 0 : i32
    return %c0_i32, %c0_i32_0 : i32, i32
  }
  func.func @transform_4(%arg0: i32) -> (i32, i32) {
    %c0_i32 = arith.constant 0 : i32
    %c0_i32_0 = arith.constant 0 : i32
    return %arg0, %c0_i32 : i32, i32
  }
}

module attributes {stable_mosaic.version = 11 : i64} {
  func.func @_transition_kernel(%arg0: i32, %arg1: memref<128x128xbf16, #tpu.memory_space<vmem>>, %arg2: memref<1x128xf32, #tpu.memory_space<vmem>>, %arg3: memref<1x128xf32, #tpu.memory_space<vmem>>, %arg4: memref<128x128xbf16, #tpu.memory_space<vmem>>, %arg5: memref<128x128xbf16, #tpu.memory_space<vmem>>) attributes {dimension_semantics = [#tpu.dimension_semantics<parallel>], iteration_bounds = array<i64: 1>, scalar_prefetch = 0 : i64, scratch_operands = 0 : i64, tpu.core_type = #tpu.core_type<tc>, window_params = [{transform_indices = @transform_0, window_bounds = array<i64: 128, 128>}, {pipeline_mode = #tpu.pipeline_mode<synchronous>, transform_indices = @transform_1, window_bounds = array<i64: 1, 128>}, {pipeline_mode = #tpu.pipeline_mode<synchronous>, transform_indices = @transform_2, window_bounds = array<i64: 1, 128>}, {pipeline_mode = #tpu.pipeline_mode<synchronous>, transform_indices = @transform_3, window_bounds = array<i64: 128, 128>}, {transform_indices = @transform_4, window_bounds = array<i64: 128, 128>}]} {
    %c0 = arith.constant 0 : index
    %c0_0 = arith.constant 0 : index
    %0 = vector.load %arg1[%c0, %c0_0] : memref<128x128xbf16, #tpu.memory_space<vmem>>, vector<128x128xbf16>
    %1 = arith.extf %0 : vector<128x128xbf16> to vector<128x128xf32>
    %c0_1 = arith.constant 0 : index
    %c0_2 = arith.constant 0 : index
    %2 = vector.load %arg2[%c0_1, %c0_2] : memref<1x128xf32, #tpu.memory_space<vmem>>, vector<1x128xf32>
    %3 = vector.broadcast %2 : vector<1x128xf32> to vector<128x128xf32>
    %4 = arith.mulf %1, %3 : vector<128x128xf32>
    %c0_3 = arith.constant 0 : index
    %c0_4 = arith.constant 0 : index
    %5 = vector.load %arg3[%c0_3, %c0_4] : memref<1x128xf32, #tpu.memory_space<vmem>>, vector<1x128xf32>
    %6 = vector.broadcast %5 : vector<1x128xf32> to vector<128x128xf32>
    %7 = arith.addf %4, %6 : vector<128x128xf32>
    %cst = arith.constant 0.000000e+00 : f32
    %8 = vector.broadcast %cst : f32 to vector<128x128xf32>
    %9 = arith.maximumf %7, %8 : vector<128x128xf32>
    %10 = arith.truncf %9 : vector<128x128xf32> to vector<128x128xbf16>
    %c0_5 = arith.constant 0 : index
    %c0_6 = arith.constant 0 : index
    %11 = vector.load %arg4[%c0_5, %c0_6] : memref<128x128xbf16, #tpu.memory_space<vmem>>, vector<128x128xbf16>
    %cst_7 = arith.constant dense<0.000000e+00> : vector<128x128xf32>
    %12 = tpu.matmul %10, %11, %cst_7 {dimension_numbers = #tpu.dot_dimension_numbers<[1], [0], [0], [1], [0, 0, 1, 1], [], []>} : vector<128x128xbf16>, vector<128x128xbf16>, vector<128x128xf32> -> vector<128x128xf32>
    %13 = arith.truncf %12 : vector<128x128xf32> to vector<128x128xbf16>
    %c0_8 = arith.constant 0 : index
    %c0_9 = arith.constant 0 : index
    %14 = vector.load %arg5[%c0_8, %c0_9] : memref<128x128xbf16, #tpu.memory_space<vmem>>, vector<128x128xbf16>
    tpu.vector_store %arg5[%c0_8, %c0_9], %13 {strides = array<i32>} : memref<128x128xbf16, #tpu.memory_space<vmem>>, vector<128x128xbf16>,
    return
  }
  func.func @transform_0(%arg0: i32) -> (i32, i32) {
    %c0_i32 = arith.constant 0 : i32
    %c0_i32_0 = arith.constant 0 : i32
    return %arg0, %c0_i32 : i32, i32
  }
  func.func @transform_1(%arg0: i32) -> (i32, i32) {
    %c0_i32 = arith.constant 0 : i32
    %c0_i32_0 = arith.constant 0 : i32
    %c0_i32_1 = arith.constant 0 : i32
    return %c0_i32, %c0_i32_0 : i32, i32
  }
  func.func @transform_2(%arg0: i32) -> (i32, i32) {
    %c0_i32 = arith.constant 0 : i32
    %c0_i32_0 = arith.constant 0 : i32
    %c0_i32_1 = arith.constant 0 : i32
    return %c0_i32, %c0_i32_0 : i32, i32
  }
  func.func @transform_3(%arg0: i32) -> (i32, i32) {
    %c0_i32 = arith.constant 0 : i32
    %c0_i32_0 = arith.constant 0 : i32
    %c0_i32_1 = arith.constant 0 : i32
    return %c0_i32, %c0_i32_0 : i32, i32
  }
  func.func @transform_4(%arg0: i32) -> (i32, i32) {
    %c0_i32 = arith.constant 0 : i32
    %c0_i32_0 = arith.constant 0 : i32
    return %arg0, %c0_i32 : i32, i32
  }
}

</mosaic_0001>

<bundles_post_ra>
// kernel: tpu_custom_call.1
= control target key start
LH: loop header
LB: loop body
LE: loop exit
PB: predicated region body
PF: predicated region fallthrough
CT: control target
= control target key end

     0   :  { %9 = vsyncpa [#allocation3], 0  ;;  %s769_s0 = inlined_call_operand.hbm [shape: bf16[128,128], index: 0, kind: input, shape index: {}]   ;;  %s770_s1 = inlined_call_operand.vmem [shape: f32[1,128], index: 1, kind: input, shape index: {}]   ;;  %s771_s2 = inlined_call_operand.vmem [shape: f32[1,128], index: 2, kind: input, shape index: {}]   ;;  %s772_s3 = inlined_call_operand.hbm [shape: bf16[128,128], index: 3, kind: input, shape index: {}]   ;;  %s773_s4 = inlined_call_operand.hbm [shape: bf16[128,128], index: 4, kind: output, shape index: {}]  }
   0x1   :  { %10 = vsyncpa [#allocation6], 0 }
   0x2   :  { %11 = vsyncpa [#allocation4], 0  ;;  %s679_s15 = smov [#allocation2]  }
   0x3   :  { %s17_s16 = sshll.u32 %s679_s15, 4  ;;  %s18_s16 = int_to_ptr.vmem [resolvable:$true] %s17_s16 }
   0x4   :  { %s621_s17 = scalar_lea.vmem %s18_s16, 1024  ;;  %p626_p1 = scmp.lt.s32.totalorder %s18_s16, %s18_s16 }
   0x5   :  { %p622_p0 = scmp.ne.s32.totalorder %s18_s16, %s621_s17  ;;  %p627_p2 = scmp.lt.s32.totalorder %s621_s17, %s621_s17 }
   0x7   :  { %p628_p3 = por %p627_p2, %p626_p1 }
   0x9   :  { %p629_p4 = pnand %p628_p3, %p622_p0 }
   0xb   :  { %632 = shalt.err (!%p629_p4)
}
   0xc   :  { %s680_s18 = smov 64   ;;  %s681_s19 = smov 4  }
   0xd   :  { %23 = dma.hbm_to_vmem [thread:$0]  %s769_s0, 1024, %s18_s16, [#allocation3], %s680_s18, %s680_s18, %s681_s19  }
   0xe   :  { %s682_s22 = smov [#allocation5]  }
   0xf   :  { %s33_s23 = sshll.u32 %s682_s22, 4  ;;  %s34_s23 = int_to_ptr.vmem [resolvable:$true] %s33_s23 }
  0x10   :  { %s641_s24 = scalar_lea.vmem %s34_s23, 1024  ;;  %p646_p6 = scmp.lt.s32.totalorder %s34_s23, %s34_s23 }
  0x11   :  { %p642_p5 = scmp.ne.s32.totalorder %s34_s23, %s641_s24  ;;  %p647_p7 = scmp.lt.s32.totalorder %s641_s24, %s641_s24 }
  0x13   :  { %p648_p8 = por %p647_p7, %p646_p6 }
  0x15   :  { %p649_p9 = pnand %p648_p8, %p642_p5 }
  0x17   :  { %652 = shalt.err (!%p649_p9)
}
  0x18   :  { %39 = dma.hbm_to_vmem [thread:$0]  %s772_s3, 1024, %s34_s23, [#allocation6], %s680_s18, %s680_s18, %s681_s19  }
  0x19   :  { %673 = dma.done.wait [#allocation3], 1024  }
  0x1a   :  { %674 = vsyncadd [#allocation3], 4294966272 }
  0x1b   :  { %675 = dma.done.wait [#allocation6], 1024  }
  0x1c   :  { %676 = vsyncadd [#allocation6], 4294966272  ;;  %v605_v0 = vld [vmem:[#allocation5 + $0x38] sm:$0xff]   ;;  %v606_v1 = vld [vmem:[#allocation5 + $0x30] sm:$0xff]  }
  0x1d   :  { %552 = vmatprep.subr.bf16.mxu0 %v605_v0  ;;  %584 = vmatprep.subr.bf16.mxu1 %v605_v0  ;;  %v607_v2 = vld [vmem:[#allocation5 + $0x28] sm:$0xff]   ;;  %v608_v3 = vld [vmem:[#allocation5 + $0x20] sm:$0xff]   ;;  %v523_v16 = vld [vmem:[#allocation2 + $0x10] sm:$0xff]  }
  0x1e   :  { %553 = vmatpush3.bf16.msra.mxu0 %v605_v0  ;;  %592 = vmatpush3.bf16.msra.mxu1 %v605_v0  ;;  %v451_v4 = vld [vmem:[#allocation2] sm:$0xff]   ;;  %v522_v9 = vld [vmem:[#allocation2 + $0x8] sm:$0xff]   ;;  %v609_v17 = vld [vmem:[#allocation5 + $0x18] sm:$0xff]   ;;  %v460_v28 = vunpack.c.l.bf16 %v523_v16  ;;  %v461_v40 = vunpack.c.h.bf16 %v523_v16 }
  0x1f   :  { %554 = vmatprep.subr.bf16.mxu0 %v606_v1  ;;  %585 = vmatprep.subr.bf16.mxu1 %v606_v1  ;;  %v724_v5 = vld [vmem:[%s770_s1] ss:$0 sm:$0xff]  ;;  %v452_v6 = vunpack.c.l.bf16 %v451_v4  ;;  %v453_v7 = vunpack.c.h.bf16 %v451_v4  ;;  %v526_v13 = vld [vmem:[#allocation2 + $0x28] sm:$0xff]   ;;  %v456_v20 = vunpack.c.l.bf16 %v522_v9  ;;  %v457_v21 = vunpack.c.h.bf16 %v522_v9  ;;  %v527_v31 = vld [vmem:[#allocation2 + $0x30] sm:$0xff]   ;;  %s683_s1 = smov [#allocation7]  }
  0x20   :  { %v525_v8 = vld [vmem:[#allocation2 + $0x20] sm:$0xff]   ;;  %v472_v24 = vunpack.c.l.bf16 %v526_v13  ;;  %v473_v25 = vunpack.c.h.bf16 %v526_v13  ;;  %v610_v32 = vld [vmem:[#allocation5 + $0x10] sm:$0xff]   ;;  %v90_v42 = vmul.f32 %v460_v28, %v724_v5  ;;  %v476_v43 = vunpack.c.l.bf16 %v527_v31  ;;  %v524_v44 = vld [vmem:[#allocation2 + $0x18] sm:$0xff]  }
  0x21   :  { %v729_v10 = vld [vmem:[%s771_s2] ss:$0 sm:$0xff]  ;;  %v468_v11 = vunpack.c.l.bf16 %v525_v8  ;;  %v469_v12 = vunpack.c.h.bf16 %v525_v8  ;;  %v86_v14 = vmul.f32 %v452_v6, %v724_v5  ;;  %v87_v15 = vmul.f32 %v453_v7, %v724_v5  ;;  %v528_v47 = vld [vmem:[#allocation2 + $0x38] sm:$0xff]   ;;  %v611_v48 = vld [vmem:[#allocation5 + $0x8] sm:$0xff]   ;;  %s395_s2 = sshll.u32 %s683_s1, 4  ;;  %s396_s2 = int_to_ptr.vmem [resolvable:$true] %s395_s2 }
  0x22   :  { %555 = vmatpush3.bf16.msra.mxu0 %v606_v1  ;;  %593 = vmatpush3.bf16.msra.mxu1 %v606_v1  ;;  %v88_v35 = vmul.f32 %v456_v20, %v724_v5  ;;  %v89_v36 = vmul.f32 %v457_v21, %v724_v5  ;;  %v96_v38 = vmul.f32 %v472_v24, %v724_v5  ;;  %v477_v46 = vunpack.c.h.bf16 %v527_v31  ;;  %v612_v63 = vld [vmem:[#allocation5] sm:$0xff]   ;;  %s653_s29 = scalar_lea.vmem %s396_s2, 1024  ;;  %p658_p11 = scmp.lt.s32.totalorder %s396_s2, %s396_s2 }
  0x23   :  { %556 = vmatprep.subr.bf16.mxu0 %v607_v2  ;;  %586 = vmatprep.subr.bf16.mxu1 %v607_v2  ;;  %v94_v18 = vmul.f32 %v468_v11, %v724_v5  ;;  %v95_v19 = vmul.f32 %v469_v12, %v724_v5  ;;  %v109_v22 = vadd.f32 %v729_v10, %v86_v14  ;;  %v464_v55 = vunpack.c.l.bf16 %v524_v44  ;;  %p654_p10 = scmp.ne.s32.totalorder %s396_s2, %s653_s29  ;;  %p659_p12 = scmp.lt.s32.totalorder %s653_s29, %s653_s29 }
  0x24   :  { %v110_v23 = vadd.f32 %v729_v10, %v87_v15  ;;  %v97_v39 = vmul.f32 %v473_v25, %v724_v5  ;;  %v91_v45 = vmul.f32 %v461_v40, %v724_v5  ;;  %v111_v49 = vadd.f32 %v729_v10, %v88_v35 }
  0x25   :  { %v117_v26 = vadd.f32 %v729_v10, %v94_v18  ;;  %v118_v27 = vadd.f32 %v729_v10, %v95_v19  ;;  %v125_v29 = vmax.f32 %v109_v22, 0.0  ;;  %v112_v50 = vadd.f32 %v729_v10, %v89_v36  ;;  %p660_p13 = por %p659_p12, %p658_p11 }
  0x26   :  { %557 = vmatpush3.bf16.msra.mxu0 %v607_v2  ;;  %594 = vmatpush3.bf16.msra.mxu1 %v607_v2  ;;  %v126_v30 = vmax.f32 %v110_v23, 0.0  ;;  %v98_v51 = vmul.f32 %v476_v43, %v724_v5  ;;  %v119_v52 = vadd.f32 %v729_v10, %v96_v38  ;;  %v120_v53 = vadd.f32 %v729_v10, %v97_v39 }
  0x27   :  { %558 = vmatprep.subr.bf16.mxu0 %v608_v3  ;;  %587 = vmatprep.subr.bf16.mxu1 %v608_v3  ;;  %v133_v33 = vmax.f32 %v117_v26, 0.0  ;;  %v134_v34 = vmax.f32 %v118_v27, 0.0  ;;  %v99_v54 = vmul.f32 %v477_v46, %v724_v5  ;;  %v113_v56 = vadd.f32 %v729_v10, %v90_v42  ;;  %p661_p0 = pnand %p660_p13, %p654_p10 }
  0x28   :  { %v141_v37 = vpack.c.bf16 %v126_v30, %v125_v29  ;;  %v465_v57 = vunpack.c.h.bf16 %v524_v44  ;;  %v480_v58 = vunpack.c.l.bf16 %v528_v47  ;;  %v481_v59 = vunpack.c.h.bf16 %v528_v47 }
  0x29   :  { %v145_v41 = vpack.c.bf16 %v134_v34, %v133_v33  ;;  %v114_v60 = vadd.f32 %v729_v10, %v91_v45  ;;  %v121_v61 = vadd.f32 %v729_v10, %v98_v51  ;;  %v122_v62 = vadd.f32 %v729_v10, %v99_v54 }
  0x2a   :  { %559 = vmatpush3.bf16.msra.mxu0 %v608_v3  ;;  %595 = vmatpush3.bf16.msra.mxu1 %v608_v3  ;;  %v127_v0 = vmax.f32 %v111_v49, 0.0  ;;  %v128_v1 = vmax.f32 %v112_v50, 0.0  ;;  %v135_v2 = vmax.f32 %v119_v52, 0.0  ;;  %v136_v3 = vmax.f32 %v120_v53, 0.0 }
  0x2b   :  { %560 = vmatprep.subr.bf16.mxu0 %v609_v17  ;;  %588 = vmatprep.subr.bf16.mxu1 %v609_v17  ;;  %v92_v4 = vmul.f32 %v464_v55, %v724_v5  ;;  %v93_v6 = vmul.f32 %v465_v57, %v724_v5  ;;  %v100_v7 = vmul.f32 %v480_v58, %v724_v5  ;;  %v129_v9 = vmax.f32 %v113_v56, 0.0 }
  0x2c   :  { %568 = vmatprep.mubr.bf16.mxu0 %v141_v37  ;;  %576 = vmatprep.mubr.bf16.mxu1 %v145_v41  ;;  %v101_v8 = vmul.f32 %v481_v59, %v724_v5  ;;  %v130_v11 = vmax.f32 %v114_v60, 0.0  ;;  %v137_v12 = vmax.f32 %v121_v61, 0.0  ;;  %v138_v13 = vmax.f32 %v122_v62, 0.0 }
  0x2d   :  { %v142_v14 = vpack.c.bf16 %v128_v1, %v127_v0  ;;  %v146_v15 = vpack.c.bf16 %v136_v3, %v135_v2  ;;  %v115_v16 = vadd.f32 %v729_v10, %v92_v4  ;;  %v123_v18 = vadd.f32 %v729_v10, %v100_v7 }
  0x2e   :  { %561 = vmatpush3.bf16.msra.mxu0 %v609_v17  ;;  %596 = vmatpush3.bf16.msra.mxu1 %v609_v17  ;;  %v116_v17 = vadd.f32 %v729_v10, %v93_v6  ;;  %v124_v19 = vadd.f32 %v729_v10, %v101_v8  ;;  %v143_v5 = vpack.c.bf16 %v130_v11, %v129_v9 }
  0x2f   :  { %562 = vmatprep.subr.bf16.mxu0 %v610_v32  ;;  %589 = vmatprep.subr.bf16.mxu1 %v610_v32  ;;  %v147_v20 = vpack.c.bf16 %v138_v13, %v137_v12  ;;  %v131_v21 = vmax.f32 %v115_v16, 0.0  ;;  %v139_v23 = vmax.f32 %v123_v18, 0.0 }
  0x30   :  { %v132_v22 = vmax.f32 %v116_v17, 0.0  ;;  %v140_v24 = vmax.f32 %v124_v19, 0.0 }
  0x32   :  { %563 = vmatpush3.bf16.msra.mxu0 %v610_v32  ;;  %597 = vmatpush3.bf16.msra.mxu1 %v610_v32  ;;  %v144_v25 = vpack.c.bf16 %v132_v22, %v131_v21  ;;  %v148_v26 = vpack.c.bf16 %v140_v24, %v139_v23 }
  0x33   :  { %564 = vmatprep.subr.bf16.mxu0 %v611_v48  ;;  %590 = vmatprep.subr.bf16.mxu1 %v611_v48 }
  0x36   :  { %565 = vmatpush3.bf16.msra.mxu0 %v611_v48  ;;  %598 = vmatpush3.bf16.msra.mxu1 %v611_v48 }
  0x37   :  { %566 = vmatprep.subr.bf16.mxu0 %v612_v63  ;;  %591 = vmatprep.subr.bf16.mxu1 %v612_v63 }
  0x3a   :  { %567 = vmatpush3.bf16.msra.mxu0 %v612_v63  ;;  %599 = vmatpush3.bf16.msra.mxu1 %v612_v63 }
  0x3d   :  { %569 = vmatmul.mubr.bf16.vlgmr.msra.gmra.mxu0 %v142_v14  ;;  %577 = vmatmul.mubr.bf16.vlgmr.msra.gmra.mxu1 %v146_v15 }
  0x3e   :  { %572 = vmatprep.mubr.bf16.mxu0 %v143_v5  ;;  %580 = vmatprep.mubr.bf16.mxu1 %v147_v20 }
  0x45   :  { %573 = vmatmul.mubr.bf16.gmra.mxu0 %v144_v25  ;;  %581 = vmatmul.mubr.bf16.gmra.mxu1 %v148_v26 }
  0xfd   :  { %v570_v27 = vpop.f32.mrf.mxu0  ;;  %v578_v28 = vpop.f32.mrf.mxu1 }
  0xff   :  { %v247_v29 = vpop.f32.mrf.mxu0  ;;  %v279_v10 = vpop.f32.mrf.mxu1 }
 0x101   :  { %v571_v30 = vpop.f32.mrf.mxu0  ;;  %v579_v31 = vpop.f32.mrf.mxu1 }
 0x102   :  { %v490_v32 = vpack.c.bf16 %v571_v30, %v570_v27  ;;  %v510_v33 = vpack.c.bf16 %v579_v31, %v578_v28 }
 0x103   :  { %v250_v34 = vpop.f32.mrf.mxu0  ;;  %v282_v35 = vpop.f32.mrf.mxu1 }
 0x104   :  { %529 = vst [vmem:[#allocation7 + $0x8] sm:$0xff] %v490_v32   ;;  %533 = vst [vmem:[#allocation7 + $0x28] sm:$0xff] %v510_v33   ;;  %v485_v36 = vpack.c.bf16 %v250_v34, %v247_v29  ;;  %v505_v37 = vpack.c.bf16 %v282_v35, %v279_v10 }
 0x105   :  { %v574_v38 = vpop.f32.mrf.mxu0  ;;  %v582_v39 = vpop.f32.mrf.mxu1 }
 0x106   :  { %486 = vst [vmem:[#allocation7] sm:$0xff] %v485_v36   ;;  %532 = vst [vmem:[#allocation7 + $0x20] sm:$0xff] %v505_v37  }
 0x107   :  { %v263_v40 = vpop.f32.mrf.mxu0  ;;  %v295_v41 = vpop.f32.mrf.mxu1 }
 0x109   :  { %v575_v42 = vpop.f32.mrf.mxu0  ;;  %v583_v43 = vpop.f32.mrf.mxu1 }
 0x10a   :  { %v500_v44 = vpack.c.bf16 %v575_v42, %v574_v38  ;;  %v520_v45 = vpack.c.bf16 %v583_v43, %v582_v39 }
 0x10b   :  { %v266_v46 = vpop.f32.mrf.mxu0  ;;  %v298_v47 = vpop.f32.mrf.mxu1 }
 0x10c   :  { %531 = vst [vmem:[#allocation7 + $0x18] sm:$0xff] %v500_v44   ;;  %535 = vst [vmem:[#allocation7 + $0x38] sm:$0xff] %v520_v45   ;;  %v495_v48 = vpack.c.bf16 %v266_v46, %v263_v40  ;;  %v515_v49 = vpack.c.bf16 %v298_v47, %v295_v41 }
 0x10e   :  { %530 = vst [vmem:[#allocation7 + $0x10] sm:$0xff] %v495_v48   ;;  %534 = vst [vmem:[#allocation7 + $0x30] sm:$0xff] %v515_v49  }
 0x10f   :  { %664 = shalt.err (!%p661_p0)
}
 0x110   :  { %401 = dma.vmem_to_hbm [thread:$0]  %s396_s2, 1024, %s773_s4, [#allocation4], %s680_s18, %s680_s18, %s681_s19  }
 0x111   :  { %677 = dma.done.wait [#allocation4], 1024  }
 0x112   :  { %678 = vsyncadd [#allocation4], 4294966272 }
 0x113   :  { %405 = vsyncpa [#allocation3], 1 }
 0x114   :  { %406 = vsyncpa [#allocation6], 1 }
 0x115   :  { %407 = vsyncpa [#allocation4], 1 }

// kernel: tpu_custom_call.1
= control target key start
LH: loop header
LB: loop body
LE: loop exit
PB: predicated region body
PF: predicated region fallthrough
CT: control target
= control target key end

     0   :  { %9 = vsyncpa [#allocation3], 0  ;;  %s769_s0 = inlined_call_operand.hbm [shape: bf16[128,128], index: 0, kind: input, shape index: {}]   ;;  %s770_s1 = inlined_call_operand.vmem [shape: f32[1,128], index: 1, kind: input, shape index: {}]   ;;  %s771_s2 = inlined_call_operand.vmem [shape: f32[1,128], index: 2, kind: input, shape index: {}]   ;;  %s772_s3 = inlined_call_operand.hbm [shape: bf16[128,128], index: 3, kind: input, shape index: {}]   ;;  %s773_s4 = inlined_call_operand.hbm [shape: bf16[128,128], index: 4, kind: output, shape index: {}]  }
   0x1   :  { %10 = vsyncpa [#allocation6], 0 }
   0x2   :  { %11 = vsyncpa [#allocation4], 0  ;;  %s679_s15 = smov [#allocation2]  }
   0x3   :  { %s17_s16 = sshll.u32 %s679_s15, 4  ;;  %s18_s16 = int_to_ptr.vmem [resolvable:$true] %s17_s16 }
   0x4   :  { %s621_s17 = scalar_lea.vmem %s18_s16, 1024  ;;  %p626_p1 = scmp.lt.s32.totalorder %s18_s16, %s18_s16 }
   0x5   :  { %p622_p0 = scmp.ne.s32.totalorder %s18_s16, %s621_s17  ;;  %p627_p2 = scmp.lt.s32.totalorder %s621_s17, %s621_s17 }
   0x7   :  { %p628_p3 = por %p627_p2, %p626_p1 }
   0x9   :  { %p629_p4 = pnand %p628_p3, %p622_p0 }
   0xb   :  { %632 = shalt.err (!%p629_p4)
}
   0xc   :  { %s680_s18 = smov 64   ;;  %s681_s19 = smov 4  }
   0xd   :  { %23 = dma.hbm_to_vmem [thread:$0]  %s769_s0, 1024, %s18_s16, [#allocation3], %s680_s18, %s680_s18, %s681_s19  }
   0xe   :  { %s682_s22 = smov [#allocation5]  }
   0xf   :  { %s33_s23 = sshll.u32 %s682_s22, 4  ;;  %s34_s23 = int_to_ptr.vmem [resolvable:$true] %s33_s23 }
  0x10   :  { %s641_s24 = scalar_lea.vmem %s34_s23, 1024  ;;  %p646_p6 = scmp.lt.s32.totalorder %s34_s23, %s34_s23 }
  0x11   :  { %p642_p5 = scmp.ne.s32.totalorder %s34_s23, %s641_s24  ;;  %p647_p7 = scmp.lt.s32.totalorder %s641_s24, %s641_s24 }
  0x13   :  { %p648_p8 = por %p647_p7, %p646_p6 }
  0x15   :  { %p649_p9 = pnand %p648_p8, %p642_p5 }
  0x17   :  { %652 = shalt.err (!%p649_p9)
}
  0x18   :  { %39 = dma.hbm_to_vmem [thread:$0]  %s772_s3, 1024, %s34_s23, [#allocation6], %s680_s18, %s680_s18, %s681_s19  }
  0x19   :  { %673 = dma.done.wait [#allocation3], 1024  }
  0x1a   :  { %674 = vsyncadd [#allocation3], 4294966272 }
  0x1b   :  { %675 = dma.done.wait [#allocation6], 1024  }
  0x1c   :  { %676 = vsyncadd [#allocation6], 4294966272  ;;  %v605_v0 = vld [vmem:[#allocation5 + $0x38] sm:$0xff]   ;;  %v606_v1 = vld [vmem:[#allocation5 + $0x30] sm:$0xff]  }
  0x1d   :  { %552 = vmatprep.subr.bf16.mxu0 %v605_v0  ;;  %584 = vmatprep.subr.bf16.mxu1 %v605_v0  ;;  %v607_v2 = vld [vmem:[#allocation5 + $0x28] sm:$0xff]   ;;  %v608_v3 = vld [vmem:[#allocation5 + $0x20] sm:$0xff]   ;;  %v523_v16 = vld [vmem:[#allocation2 + $0x10] sm:$0xff]  }
  0x1e   :  { %553 = vmatpush3.bf16.msra.mxu0 %v605_v0  ;;  %592 = vmatpush3.bf16.msra.mxu1 %v605_v0  ;;  %v451_v4 = vld [vmem:[#allocation2] sm:$0xff]   ;;  %v522_v9 = vld [vmem:[#allocation2 + $0x8] sm:$0xff]   ;;  %v609_v17 = vld [vmem:[#allocation5 + $0x18] sm:$0xff]   ;;  %v460_v28 = vunpack.c.l.bf16 %v523_v16  ;;  %v461_v40 = vunpack.c.h.bf16 %v523_v16 }
  0x1f   :  { %554 = vmatprep.subr.bf16.mxu0 %v606_v1  ;;  %585 = vmatprep.subr.bf16.mxu1 %v606_v1  ;;  %v724_v5 = vld [vmem:[%s770_s1] ss:$0 sm:$0xff]  ;;  %v452_v6 = vunpack.c.l.bf16 %v451_v4  ;;  %v453_v7 = vunpack.c.h.bf16 %v451_v4  ;;  %v526_v13 = vld [vmem:[#allocation2 + $0x28] sm:$0xff]   ;;  %v456_v20 = vunpack.c.l.bf16 %v522_v9  ;;  %v457_v21 = vunpack.c.h.bf16 %v522_v9  ;;  %v527_v31 = vld [vmem:[#allocation2 + $0x30] sm:$0xff]   ;;  %s683_s1 = smov [#allocation7]  }
  0x20   :  { %v525_v8 = vld [vmem:[#allocation2 + $0x20] sm:$0xff]   ;;  %v472_v24 = vunpack.c.l.bf16 %v526_v13  ;;  %v473_v25 = vunpack.c.h.bf16 %v526_v13  ;;  %v610_v32 = vld [vmem:[#allocation5 + $0x10] sm:$0xff]   ;;  %v90_v42 = vmul.f32 %v460_v28, %v724_v5  ;;  %v476_v43 = vunpack.c.l.bf16 %v527_v31  ;;  %v524_v44 = vld [vmem:[#allocation2 + $0x18] sm:$0xff]  }
  0x21   :  { %v729_v10 = vld [vmem:[%s771_s2] ss:$0 sm:$0xff]  ;;  %v468_v11 = vunpack.c.l.bf16 %v525_v8  ;;  %v469_v12 = vunpack.c.h.bf16 %v525_v8  ;;  %v86_v14 = vmul.f32 %v452_v6, %v724_v5  ;;  %v87_v15 = vmul.f32 %v453_v7, %v724_v5  ;;  %v528_v47 = vld [vmem:[#allocation2 + $0x38] sm:$0xff]   ;;  %v611_v48 = vld [vmem:[#allocation5 + $0x8] sm:$0xff]   ;;  %s395_s2 = sshll.u32 %s683_s1, 4  ;;  %s396_s2 = int_to_ptr.vmem [resolvable:$true] %s395_s2 }
  0x22   :  { %555 = vmatpush3.bf16.msra.mxu0 %v606_v1  ;;  %593 = vmatpush3.bf16.msra.mxu1 %v606_v1  ;;  %v88_v35 = vmul.f32 %v456_v20, %v724_v5  ;;  %v89_v36 = vmul.f32 %v457_v21, %v724_v5  ;;  %v96_v38 = vmul.f32 %v472_v24, %v724_v5  ;;  %v477_v46 = vunpack.c.h.bf16 %v527_v31  ;;  %v612_v63 = vld [vmem:[#allocation5] sm:$0xff]   ;;  %s653_s29 = scalar_lea.vmem %s396_s2, 1024  ;;  %p658_p11 = scmp.lt.s32.totalorder %s396_s2, %s396_s2 }
  0x23   :  { %556 = vmatprep.subr.bf16.mxu0 %v607_v2  ;;  %586 = vmatprep.subr.bf16.mxu1 %v607_v2  ;;  %v94_v18 = vmul.f32 %v468_v11, %v724_v5  ;;  %v95_v19 = vmul.f32 %v469_v12, %v724_v5  ;;  %v109_v22 = vadd.f32 %v729_v10, %v86_v14  ;;  %v464_v55 = vunpack.c.l.bf16 %v524_v44  ;;  %p654_p10 = scmp.ne.s32.totalorder %s396_s2, %s653_s29  ;;  %p659_p12 = scmp.lt.s32.totalorder %s653_s29, %s653_s29 }
  0x24   :  { %v110_v23 = vadd.f32 %v729_v10, %v87_v15  ;;  %v97_v39 = vmul.f32 %v473_v25, %v724_v5  ;;  %v91_v45 = vmul.f32 %v461_v40, %v724_v5  ;;  %v111_v49 = vadd.f32 %v729_v10, %v88_v35 }
  0x25   :  { %v117_v26 = vadd.f32 %v729_v10, %v94_v18  ;;  %v118_v27 = vadd.f32 %v729_v10, %v95_v19  ;;  %v125_v29 = vmax.f32 %v109_v22, 0.0  ;;  %v112_v50 = vadd.f32 %v729_v10, %v89_v36  ;;  %p660_p13 = por %p659_p12, %p658_p11 }
  0x26   :  { %557 = vmatpush3.bf16.msra.mxu0 %v607_v2  ;;  %594 = vmatpush3.bf16.msra.mxu1 %v607_v2  ;;  %v126_v30 = vmax.f32 %v110_v23, 0.0  ;;  %v98_v51 = vmul.f32 %v476_v43, %v724_v5  ;;  %v119_v52 = vadd.f32 %v729_v10, %v96_v38  ;;  %v120_v53 = vadd.f32 %v729_v10, %v97_v39 }
  0x27   :  { %558 = vmatprep.subr.bf16.mxu0 %v608_v3  ;;  %587 = vmatprep.subr.bf16.mxu1 %v608_v3  ;;  %v133_v33 = vmax.f32 %v117_v26, 0.0  ;;  %v134_v34 = vmax.f32 %v118_v27, 0.0  ;;  %v99_v54 = vmul.f32 %v477_v46, %v724_v5  ;;  %v113_v56 = vadd.f32 %v729_v10, %v90_v42  ;;  %p661_p0 = pnand %p660_p13, %p654_p10 }
  0x28   :  { %v141_v37 = vpack.c.bf16 %v126_v30, %v125_v29  ;;  %v465_v57 = vunpack.c.h.bf16 %v524_v44  ;;  %v480_v58 = vunpack.c.l.bf16 %v528_v47  ;;  %v481_v59 = vunpack.c.h.bf16 %v528_v47 }
  0x29   :  { %v145_v41 = vpack.c.bf16 %v134_v34, %v133_v33  ;;  %v114_v60 = vadd.f32 %v729_v10, %v91_v45  ;;  %v121_v61 = vadd.f32 %v729_v10, %v98_v51  ;;  %v122_v62 = vadd.f32 %v729_v10, %v99_v54 }
  0x2a   :  { %559 = vmatpush3.bf16.msra.mxu0 %v608_v3  ;;  %595 = vmatpush3.bf16.msra.mxu1 %v608_v3  ;;  %v127_v0 = vmax.f32 %v111_v49, 0.0  ;;  %v128_v1 = vmax.f32 %v112_v50, 0.0  ;;  %v135_v2 = vmax.f32 %v119_v52, 0.0  ;;  %v136_v3 = vmax.f32 %v120_v53, 0.0 }
  0x2b   :  { %560 = vmatprep.subr.bf16.mxu0 %v609_v17  ;;  %588 = vmatprep.subr.bf16.mxu1 %v609_v17  ;;  %v92_v4 = vmul.f32 %v464_v55, %v724_v5  ;;  %v93_v6 = vmul.f32 %v465_v57, %v724_v5  ;;  %v100_v7 = vmul.f32 %v480_v58, %v724_v5  ;;  %v129_v9 = vmax.f32 %v113_v56, 0.0 }
  0x2c   :  { %568 = vmatprep.mubr.bf16.mxu0 %v141_v37  ;;  %576 = vmatprep.mubr.bf16.mxu1 %v145_v41  ;;  %v101_v8 = vmul.f32 %v481_v59, %v724_v5  ;;  %v130_v11 = vmax.f32 %v114_v60, 0.0  ;;  %v137_v12 = vmax.f32 %v121_v61, 0.0  ;;  %v138_v13 = vmax.f32 %v122_v62, 0.0 }
  0x2d   :  { %v142_v14 = vpack.c.bf16 %v128_v1, %v127_v0  ;;  %v146_v15 = vpack.c.bf16 %v136_v3, %v135_v2  ;;  %v115_v16 = vadd.f32 %v729_v10, %v92_v4  ;;  %v123_v18 = vadd.f32 %v729_v10, %v100_v7 }
  0x2e   :  { %561 = vmatpush3.bf16.msra.mxu0 %v609_v17  ;;  %596 = vmatpush3.bf16.msra.mxu1 %v609_v17  ;;  %v116_v17 = vadd.f32 %v729_v10, %v93_v6  ;;  %v124_v19 = vadd.f32 %v729_v10, %v101_v8  ;;  %v143_v5 = vpack.c.bf16 %v130_v11, %v129_v9 }
  0x2f   :  { %562 = vmatprep.subr.bf16.mxu0 %v610_v32  ;;  %589 = vmatprep.subr.bf16.mxu1 %v610_v32  ;;  %v147_v20 = vpack.c.bf16 %v138_v13, %v137_v12  ;;  %v131_v21 = vmax.f32 %v115_v16, 0.0  ;;  %v139_v23 = vmax.f32 %v123_v18, 0.0 }
  0x30   :  { %v132_v22 = vmax.f32 %v116_v17, 0.0  ;;  %v140_v24 = vmax.f32 %v124_v19, 0.0 }
  0x32   :  { %563 = vmatpush3.bf16.msra.mxu0 %v610_v32  ;;  %597 = vmatpush3.bf16.msra.mxu1 %v610_v32  ;;  %v144_v25 = vpack.c.bf16 %v132_v22, %v131_v21  ;;  %v148_v26 = vpack.c.bf16 %v140_v24, %v139_v23 }
  0x33   :  { %564 = vmatprep.subr.bf16.mxu0 %v611_v48  ;;  %590 = vmatprep.subr.bf16.mxu1 %v611_v48 }
  0x36   :  { %565 = vmatpush3.bf16.msra.mxu0 %v611_v48  ;;  %598 = vmatpush3.bf16.msra.mxu1 %v611_v48 }
  0x37   :  { %566 = vmatprep.subr.bf16.mxu0 %v612_v63  ;;  %591 = vmatprep.subr.bf16.mxu1 %v612_v63 }
  0x3a   :  { %567 = vmatpush3.bf16.msra.mxu0 %v612_v63  ;;  %599 = vmatpush3.bf16.msra.mxu1 %v612_v63 }
  0x3d   :  { %569 = vmatmul.mubr.bf16.vlgmr.msra.gmra.mxu0 %v142_v14  ;;  %577 = vmatmul.mubr.bf16.vlgmr.msra.gmra.mxu1 %v146_v15 }
  0x3e   :  { %572 = vmatprep.mubr.bf16.mxu0 %v143_v5  ;;  %580 = vmatprep.mubr.bf16.mxu1 %v147_v20 }
  0x45   :  { %573 = vmatmul.mubr.bf16.gmra.mxu0 %v144_v25  ;;  %581 = vmatmul.mubr.bf16.gmra.mxu1 %v148_v26 }
  0xfd   :  { %v570_v27 = vpop.f32.mrf.mxu0  ;;  %v578_v28 = vpop.f32.mrf.mxu1 }
  0xff   :  { %v247_v29 = vpop.f32.mrf.mxu0  ;;  %v279_v10 = vpop.f32.mrf.mxu1 }
 0x101   :  { %v571_v30 = vpop.f32.mrf.mxu0  ;;  %v579_v31 = vpop.f32.mrf.mxu1 }
 0x102   :  { %v490_v32 = vpack.c.bf16 %v571_v30, %v570_v27  ;;  %v510_v33 = vpack.c.bf16 %v579_v31, %v578_v28 }
 0x103   :  { %v250_v34 = vpop.f32.mrf.mxu0  ;;  %v282_v35 = vpop.f32.mrf.mxu1 }
 0x104   :  { %529 = vst [vmem:[#allocation7 + $0x8] sm:$0xff] %v490_v32   ;;  %533 = vst [vmem:[#allocation7 + $0x28] sm:$0xff] %v510_v33   ;;  %v485_v36 = vpack.c.bf16 %v250_v34, %v247_v29  ;;  %v505_v37 = vpack.c.bf16 %v282_v35, %v279_v10 }
 0x105   :  { %v574_v38 = vpop.f32.mrf.mxu0  ;;  %v582_v39 = vpop.f32.mrf.mxu1 }
 0x106   :  { %486 = vst [vmem:[#allocation7] sm:$0xff] %v485_v36   ;;  %532 = vst [vmem:[#allocation7 + $0x20] sm:$0xff] %v505_v37  }
 0x107   :  { %v263_v40 = vpop.f32.mrf.mxu0  ;;  %v295_v41 = vpop.f32.mrf.mxu1 }
 0x109   :  { %v575_v42 = vpop.f32.mrf.mxu0  ;;  %v583_v43 = vpop.f32.mrf.mxu1 }
 0x10a   :  { %v500_v44 = vpack.c.bf16 %v575_v42, %v574_v38  ;;  %v520_v45 = vpack.c.bf16 %v583_v43, %v582_v39 }
 0x10b   :  { %v266_v46 = vpop.f32.mrf.mxu0  ;;  %v298_v47 = vpop.f32.mrf.mxu1 }
 0x10c   :  { %531 = vst [vmem:[#allocation7 + $0x18] sm:$0xff] %v500_v44   ;;  %535 = vst [vmem:[#allocation7 + $0x38] sm:$0xff] %v520_v45   ;;  %v495_v48 = vpack.c.bf16 %v266_v46, %v263_v40  ;;  %v515_v49 = vpack.c.bf16 %v298_v47, %v295_v41 }
 0x10e   :  { %530 = vst [vmem:[#allocation7 + $0x10] sm:$0xff] %v495_v48   ;;  %534 = vst [vmem:[#allocation7 + $0x30] sm:$0xff] %v515_v49  }
 0x10f   :  { %664 = shalt.err (!%p661_p0)
}
 0x110   :  { %401 = dma.vmem_to_hbm [thread:$0]  %s396_s2, 1024, %s773_s4, [#allocation4], %s680_s18, %s680_s18, %s681_s19  }
 0x111   :  { %677 = dma.done.wait [#allocation4], 1024  }
 0x112   :  { %678 = vsyncadd [#allocation4], 4294966272 }
 0x113   :  { %405 = vsyncpa [#allocation3], 1 }
 0x114   :  { %406 = vsyncpa [#allocation6], 1 }
 0x115   :  { %407 = vsyncpa [#allocation4], 1 }

</bundles_post_ra>
